<compile_context>
chip_gen: v7x
topology: tpu7x:2x2x1
jax: 0.10.0
libtpu: 0.0.40
codegen_flags: <defaults>
</compile_context>

<pallas_src>
import functools

import jax
import jax.numpy as jnp
from jax import lax
from jax.experimental import pallas as pl
from jax.experimental.pallas import tpu as pltpu


def _kl_row_kernel(s0_ref, s1_ref, out_ref, *, m_total: int):
    i = pl.program_id(0)
    s0 = s0_ref[...].astype(jnp.float32)
    s1 = s1_ref[...].astype(jnp.float32)
    tm, n = s0.shape

    # Mask rows past the true m (partial last block): padded-block contents
    # are unspecified, so replace them with zeros before exp/log/sum.
    row_ids = i * tm + lax.broadcasted_iota(jnp.int32, (tm, 1), 0)
    valid = row_ids < m_total
    s0 = jnp.where(valid, s0, 0.0)
    s1 = jnp.where(valid, s1, 0.0)

    # log_softmax(sim_matrix0, dim=-1), numerically stable.
    z0 = s0 - jnp.max(s0, axis=-1, keepdims=True)
    lse0 = jnp.log(jnp.sum(jnp.exp(z0), axis=-1, keepdims=True))
    logpt0 = z0 - lse0

    # softmax(sim_matrix1, dim=-1) arranged so the only divide is per-row:
    #   p1 = e1 / l1,  log(p1) = z1 - log(l1)
    #   sum_j p1*(log p1 - logpt0) = (1/l1) * sum_j e1*((z1 - logpt0) - log l1)
    z1 = s1 - jnp.max(s1, axis=-1, keepdims=True)
    e1 = jnp.exp(z1)
    l1 = jnp.sum(e1, axis=-1, keepdims=True)
    log_l1 = jnp.log(l1)

    inner = e1 * ((z1 - logpt0) - log_l1)
    row_sum = jnp.sum(inner, axis=-1, keepdims=True)         # (tm, 1)
    row_kl = row_sum * pl.reciprocal(l1, approx=False)       # exact per-row 1/l1
    out_ref[...] = jnp.where(valid, row_kl, 0.0)


def _pick_tile_rows(m: int, n: int, itemsize_sum: int,
                    budget_bytes: int = 24 * 1024 * 1024) -> int:
    # Two inputs, each double-buffered: resident bytes ~= 2 * TM * n * sum(itemsizes).
    max_tm = budget_bytes // (2 * n * itemsize_sum)
    tm = max(8, (int(max_tm) // 8) * 8)
    return m if tm >= m else tm


def kl_loss(sim_matrix0, sim_matrix1, *, tile_rows=None):
    """Pallas implementation of the `KL` module forward pass."""
    m, n = sim_matrix0.shape
    assert sim_matrix1.shape == (m, n), "inputs must have the same shape"

    itemsize_sum = sim_matrix0.dtype.itemsize + sim_matrix1.dtype.itemsize
    tm = _pick_tile_rows(m, n, itemsize_sum) if tile_rows is None else int(tile_rows)
    if tm < m:
        assert tm % 8 == 0, "tile_rows must be a multiple of 8 when it tiles the rows"
    else:
        tm = m
    nb = -(-m // tm)

    kernel = functools.partial(_kl_row_kernel, m_total=m)
    row_kl = pl.pallas_call(
        kernel,
        out_shape=jax.ShapeDtypeStruct((m, 1), jnp.float32),
        grid=(nb,),
        in_specs=[
            pl.BlockSpec((tm, n), lambda i: (i, 0)),
            pl.BlockSpec((tm, n), lambda i: (i, 0)),
        ],
        out_specs=pl.BlockSpec((tm, 1), lambda i: (i, 0)),
        compiler_params=pltpu.CompilerParams(
            dimension_semantics=("parallel",),
            vmem_limit_bytes=32 * 1024 * 1024,
        ),
    )(sim_matrix0, sim_matrix1)

    # F.kl_div(..., reduction='mean') divides by the total element count m*n.
    return jnp.sum(row_kl) / jnp.float32(m * n)


def _reference(sim_matrix0, sim_matrix1):
    m, n = sim_matrix0.shape
    logpt0 = jax.nn.log_softmax(sim_matrix0.astype(jnp.float32), axis=-1)
    p1 = jax.nn.softmax(sim_matrix1.astype(jnp.float32), axis=-1)
    kl = p1 * (jnp.log(p1) - logpt0)   # pointwise kl_div (softmax targets are > 0)
    return jnp.sum(kl) / (m * n)


if __name__ == "__main__":
    key = jax.random.PRNGKey(0)
    k0, k1, k2, k3 = jax.random.split(key, 4)

    # Case 1: rows divide evenly into 8-row tiles (grid of 2 blocks).
    m, n = 16, 256
    s0 = jax.random.normal(k0, (m, n), dtype=jnp.float32)
    s1 = jax.random.normal(k1, (m, n), dtype=jnp.float32)
    out = jax.block_until_ready(kl_loss(s0, s1, tile_rows=8))
    ref = _reference(s0, s1)
    assert jnp.allclose(out, ref, atol=1e-6, rtol=1e-5), (out, ref)

    # Case 2: m not a multiple of the tile (exercises padded-row masking).
    m2, n2 = 20, 384
    t0 = jax.random.normal(k2, (m2, n2), dtype=jnp.float32)
    t1 = jax.random.normal(k3, (m2, n2), dtype=jnp.float32)
    out2 = jax.block_until_ready(kl_loss(t0, t1, tile_rows=8))
    ref2 = _reference(t0, t1)
    assert jnp.allclose(out2, ref2, atol=1e-6, rtol=1e-5), (out2, ref2)

    print("KERNEL_OK")
</pallas_src>

<mosaic_0001>
module attributes {stable_mosaic.version = 11 : i64} {
  func.func @_kl_row_kernel(%arg0: i32, %arg1: memref<8x256xf32, #tpu.memory_space<vmem>>, %arg2: memref<8x256xf32, #tpu.memory_space<vmem>>, %arg3: memref<8x1xf32, #tpu.memory_space<vmem>>) attributes {dimension_semantics = [#tpu.dimension_semantics<parallel>], iteration_bounds = array<i64: 2>, scalar_prefetch = 0 : i64, scratch_operands = 0 : i64, tpu.core_type = #tpu.core_type<tc>, window_params = [{transform_indices = @transform_0, window_bounds = array<i64: 8, 256>}, {transform_indices = @transform_1, window_bounds = array<i64: 8, 256>}, {transform_indices = @transform_2, window_bounds = array<i64: 8, 1>}]} {
    %c0 = arith.constant 0 : index
    %c0_0 = arith.constant 0 : index
    %0 = vector.load %arg1[%c0, %c0_0] : memref<8x256xf32, #tpu.memory_space<vmem>>, vector<8x256xf32>
    %c0_1 = arith.constant 0 : index
    %c0_2 = arith.constant 0 : index
    %1 = vector.load %arg2[%c0_1, %c0_2] : memref<8x256xf32, #tpu.memory_space<vmem>>, vector<8x256xf32>
    %c8_i32 = arith.constant 8 : i32
    %2 = arith.muli %arg0, %c8_i32 : i32
    %3 = tpu.iota {dimensions = array<i32: 0>} : vector<8x1xi32>
    %4 = vector.broadcast %2 : i32 to vector<8x1xi32>
    %5 = arith.addi %4, %3 : vector<8x1xi32>
    %c16_i32 = arith.constant 16 : i32
    %6 = vector.broadcast %c16_i32 : i32 to vector<8x1xi32>
    %7 = arith.cmpi slt, %5, %6 : vector<8x1xi32>
    %cst = arith.constant 0.000000e+00 : f32
    %8 = vector.shape_cast %7 : vector<8x1xi1> to vector<8x1xi1>
    %9 = vector.broadcast %8 : vector<8x1xi1> to vector<8x256xi1>
    %10 = vector.broadcast %cst : f32 to vector<8x256xf32>
    %11 = arith.select %9, %0, %10 : vector<8x256xi1>, vector<8x256xf32>
    %cst_3 = arith.constant 0.000000e+00 : f32
    %12 = vector.shape_cast %7 : vector<8x1xi1> to vector<8x1xi1>
    %13 = vector.broadcast %12 : vector<8x1xi1> to vector<8x256xi1>
    %14 = vector.broadcast %cst_3 : f32 to vector<8x256xf32>
    %15 = arith.select %13, %1, %14 : vector<8x256xi1>, vector<8x256xf32>
    %cst_4 = arith.constant dense<0xFF800000> : vector<8xf32>
    %16 = vector.multi_reduction <maximumf>, %11, %cst_4 [1] : vector<8x256xf32> to vector<8xf32>
    %17 = vector.shape_cast %16 : vector<8xf32> to vector<8x1xf32>
    %18 = vector.broadcast %17 : vector<8x1xf32> to vector<8x256xf32>
    %19 = arith.subf %11, %18 : vector<8x256xf32>
    %20 = math.exp %19 : vector<8x256xf32>
    %cst_5 = arith.constant dense<0.000000e+00> : vector<8xf32>
    %21 = vector.multi_reduction <add>, %20, %cst_5 [1] : vector<8x256xf32> to vector<8xf32>
    %22 = vector.shape_cast %21 : vector<8xf32> to vector<8x1xf32>
    %23 = math.log %22 : vector<8x1xf32>
    %24 = vector.broadcast %23 : vector<8x1xf32> to vector<8x256xf32>
    %25 = arith.subf %19, %24 : vector<8x256xf32>
    %cst_6 = arith.constant dense<0xFF800000> : vector<8xf32>
    %26 = vector.multi_reduction <maximumf>, %15, %cst_6 [1] : vector<8x256xf32> to vector<8xf32>
    %27 = vector.shape_cast %26 : vector<8xf32> to vector<8x1xf32>
    %28 = vector.broadcast %27 : vector<8x1xf32> to vector<8x256xf32>
    %29 = arith.subf %15, %28 : vector<8x256xf32>
    %30 = math.exp %29 : vector<8x256xf32>
    %cst_7 = arith.constant dense<0.000000e+00> : vector<8xf32>
    %31 = vector.multi_reduction <add>, %30, %cst_7 [1] : vector<8x256xf32> to vector<8xf32>
    %32 = vector.shape_cast %31 : vector<8xf32> to vector<8x1xf32>
    %33 = math.log %32 : vector<8x1xf32>
    %34 = arith.subf %29, %25 : vector<8x256xf32>
    %35 = vector.broadcast %33 : vector<8x1xf32> to vector<8x256xf32>
    %36 = arith.subf %34, %35 : vector<8x256xf32>
    %37 = arith.mulf %30, %36 : vector<8x256xf32>
    %cst_8 = arith.constant dense<0.000000e+00> : vector<8xf32>
    %38 = vector.multi_reduction <add>, %37, %cst_8 [1] : vector<8x256xf32> to vector<8xf32>
    %39 = vector.shape_cast %38 : vector<8xf32> to vector<8x1xf32>
    %40 = tpu.reciprocal %32 : vector<8x1xf32> -> vector<8x1xf32>
    %41 = arith.mulf %39, %40 : vector<8x1xf32>
    %cst_9 = arith.constant 0.000000e+00 : f32
    %42 = vector.broadcast %cst_9 : f32 to vector<8x1xf32>
    %43 = arith.select %7, %41, %42 : vector<8x1xi1>, vector<8x1xf32>
    %c0_10 = arith.constant 0 : index
    %c0_11 = arith.constant 0 : index
    %44 = vector.load %arg3[%c0_10, %c0_11] : memref<8x1xf32, #tpu.memory_space<vmem>>, vector<8x1xf32>
    tpu.vector_store %arg3[%c0_10, %c0_11], %43 {strides = array<i32>} : memref<8x1xf32, #tpu.memory_space<vmem>>, vector<8x1xf32>,
    return
  }
  func.func @transform_0(%arg0: i32) -> (i32, i32) {
    %c0_i32 = arith.constant 0 : i32
    %c0_i32_0 = arith.constant 0 : i32
    return %arg0, %c0_i32 : i32, i32
  }
  func.func @transform_1(%arg0: i32) -> (i32, i32) {
    %c0_i32 = arith.constant 0 : i32
    %c0_i32_0 = arith.constant 0 : i32
    return %arg0, %c0_i32 : i32, i32
  }
  func.func @transform_2(%arg0: i32) -> (i32, i32) {
    %c0_i32 = arith.constant 0 : i32
    %c0_i32_0 = arith.constant 0 : i32
    return %arg0, %c0_i32 : i32, i32
  }
}

</mosaic_0001>

<bundles_post_ra>
// kernel: tpu_custom_call.1
= control target key start
LH: loop header
LB: loop body
LE: loop exit
PB: predicated region body
PF: predicated region fallthrough
CT: control target
= control target key end

     0   :  { %7 = vsyncpa [#allocation3], 0  ;;  %s707_s0 = inlined_call_operand.hbm [shape: f32[16,256], index: 0, kind: input, shape index: {}]   ;;  %s708_s1 = inlined_call_operand.hbm [shape: f32[16,256], index: 1, kind: input, shape index: {}]   ;;  %s709_s2 = inlined_call_operand.vmem [shape: f32[16,1], index: 2, kind: output, shape index: {}]  }
   0x1   :  { %9 = vsyncpa [#allocation3 + $0x1], 0 }
   0x2   :  { %10 = vsyncpa [#allocation5], 0 }
   0x3   :  { %12 = vsyncpa [#allocation5 + $0x1], 0  ;;  %s539_s9 = smov 0   ;;  %s541_s10 = smov 0  }
   0x4   :  { %s543_s11 = smov 0   ;;  %s545_s12 = smov 0  }
   0x5 LB: > { %s558_s13 = sadd.s32 4294967295, %s520_s12   ;;  %s561_s14 = sadd.s32 1, %s520_s12   ;;  %s520_s12 = sphi %s545_s12, %s721_s12   ;;  %s516_s11 = sphi %s543_s11, %s720_s11   ;;  %s512_s10 = sphi %s541_s10, %s719_s10   ;;  %s508_s9 = sphi %s539_s9, %s718_s9  }
   0x6   : > { %s22_s15 = ssub.s32 %s520_s12, %s561_s14  ;;  %s25_s16 = sadd.s32 1, %s516_s11 }
   0x7   : > { %p23_p0 = scmp.eq.s32.totalorder %s22_s15, 0  ;;  %p32_p1 = scmp.ne.s32.totalorder %s516_s11, %s512_s10 }
   0x8   : > { %p33_p2 = scmp.eq.s32.totalorder %s520_s12, 0  ;;  %p38_p3 = scmp.ne.s32.totalorder %s512_s10, %s508_s9 }
   0x9   : > { %s571_s17 = scalar_select %p23_p0, %s516_s11, %s25_s16  }
   0xa   : > { %p34_p4 = por %p33_p2, %p32_p1  ;;  %p39_p5 = scmp.eq.s32.totalorder %s558_s13, 0 }
   0xb   : > { %p375_p6 = scmp.lt.s32.totalorder %s520_s12, 2  ;;  %s580_s19 = sand.u32 1, %s516_s11  }
   0xc   : > { %p575_p7 = por %p39_p5, %p38_p3  ;;  %s349_s20 = sshll.u32 %s580_s19, 4 }
   0xd   : > { %s362_s21 = sshll.u32 %s520_s12, 8  ;;  %s118_s25 = scalar_lea.vmem [#allocation2], %s349_s20 }
   0xe   : > { %s711_s18 = scalar_select %p575_p7, 1, 0 }
   0xf   : > { %s589_s24 = scalar_lea.hbm %s707_s0, %s362_s21  ;;  %s126_s26 = sshll.u32 %s118_s25, 4  ;;  %s593_s26 = int_to_ptr.vmem [resolvable:$true] %s126_s26 }
  0x10   : > { %p595_p8 = pnand %p375_p6, %p34_p4  ;;  %s115_s28 = scalar_lea.sflag [#allocation3], %s580_s19 }
  0x11   : > { %s422_s29 = scalar_lea.hbm %s589_s24, 256  ;;  %s427_s4 = scalar_lea.hbm %s707_s0, 512 }
  0x12   : > { %p423_p11 = scmp.ne.s32.totalorder %s589_s24, %s422_s29  ;;  %p424_p12 = pneg %p595_p8 }
  0x13   : > { %p428_p1 = scmp.lt.u32.totalorder %s589_s24, %s707_s0  ;;  %p429_p2 = scmp.lt.u32.totalorder %s427_s4, %s422_s29 }
  0x14   : > { %p425_p13 = pnand %p424_p12, %p423_p11  ;;  %p431_p4 = scmp.lt.u32.totalorder %s422_s29, %s589_s24 }
  0x15   : > { %p430_p3 = por %p429_p2, %p428_p1 }
  0x16   : > { %p426_p0 = pneg %p425_p13 }
  0x17   : > { %p432_p5 = por %p431_p4, %p430_p3 }
  0x19   : > { %p433_p6 = pnand %p432_p5, %p426_p0 }
  0x1b   : > { %436 = shalt.err (!%p433_p6)
}
  0x1c   : > { %s437_s7 = scalar_lea.vmem %s593_s26, 256  ;;  %s522_s8 = smov [#allocation2]  }
  0x1d   : > { %p438_p11 = scmp.ne.s32.totalorder %s593_s26, %s437_s7  ;;  %s442_s9 = sshll.u32 %s522_s8, 4  ;;  %s443_s9 = int_to_ptr.vmem [resolvable:$false] %s442_s9 }
  0x1e   : > { %s444_s15 = scalar_lea.vmem %s443_s9, 512  ;;  %p445_p10 = scmp.lt.s32.totalorder %s593_s26, %s443_s9 }
  0x1f   : > { %p440_p13 = pnand %p438_p11, %p424_p12  ;;  %p446_p1 = scmp.lt.s32.totalorder %s444_s15, %s437_s7 }
  0x21   : > { %p441_p9 = pneg %p440_p13  ;;  %p447_p2 = por %p446_p1, %p445_p10 }
  0x23   : > { %p448_p3 = pnand %p447_p2, %p441_p9 }
  0x25   : > { %451 = shalt.err (!%p448_p3)
}
  0x26   : > { %371 = dma.hbm_to_vmem [thread:$0]  (!%p595_p8), %s589_s24, 256, %s593_s26, %s115_s28  }
  0x27   : > { %p713_p0 = scmp.lt.s32.totalorder %s520_s12, 3  ;;  %p714_p4 = scmp.ge.s32.totalorder %s520_s12, 1 }
  0x28   : > { %s640_s25 = scalar_lea.hbm %s708_s1, %s362_s21  ;;  %s137_s29 = scalar_lea.vmem [#allocation4], %s349_s20 }
  0x29   : > { %p631_p5 = pnand %p714_p4, %p713_p0  ;;  %s145_s30 = sshll.u32 %s137_s29, 4  ;;  %s146_s30 = int_to_ptr.vmem [resolvable:$true] %s145_s30 }
  0x2a   : > { %s134_s24 = scalar_lea.sflag [#allocation5], %s580_s19  ;;  %s452_s26 = scalar_lea.hbm %s640_s25, 256 }
  0x2b   : > { %s715_s16 = scalar_select %p631_p5, 1, 0 }
  0x2c   : > { %p453_p9 = scmp.ne.s32.totalorder %s640_s25, %s452_s26  ;;  %s457_s21 = scalar_lea.hbm %s708_s1, 512 }
  0x2d   : > { %p458_p11 = scmp.lt.u32.totalorder %s640_s25, %s708_s1  ;;  %p459_p13 = scmp.lt.u32.totalorder %s457_s21, %s452_s26 }
  0x2e   : > { %p455_p10 = pnand %p453_p9, %p424_p12  ;;  %p461_p2 = scmp.lt.u32.totalorder %s452_s26, %s640_s25 }
  0x2f   : > { %p460_p1 = por %p459_p13, %p458_p11 }
  0x30   : > { %p456_p6 = pneg %p455_p10 }
  0x31   : > { %p462_p3 = por %p461_p2, %p460_p1 }
  0x33   : > { %p463_p0 = pnand %p462_p3, %p456_p6 }
  0x35   : > { %466 = shalt.err (!%p463_p0)
}
  0x36   : > { %s467_s19 = scalar_lea.vmem %s146_s30, 256  ;;  %s523_s20 = smov [#allocation4]  }
  0x37   : > { %p468_p4 = scmp.ne.s32.totalorder %s146_s30, %s467_s19  ;;  %s472_s5 = sshll.u32 %s523_s20, 4  ;;  %s473_s5 = int_to_ptr.vmem [resolvable:$false] %s472_s5 }
  0x38   : > { %s474_s6 = scalar_lea.vmem %s473_s5, 512  ;;  %p475_p7 = scmp.lt.s32.totalorder %s146_s30, %s473_s5 }
  0x39   : > { %p470_p9 = pnand %p468_p4, %p424_p12  ;;  %p476_p5 = scmp.lt.s32.totalorder %s474_s6, %s467_s19 }
  0x3b   : > { %p471_p10 = pneg %p470_p9  ;;  %p477_p11 = por %p476_p5, %p475_p7 }
  0x3d   : > { %p478_p13 = pnand %p477_p11, %p471_p10 }
  0x3f   : > { %481 = shalt.err (!%p478_p13)
}
  0x40   : > { %374 = dma.hbm_to_vmem [thread:$0]  (!%p595_p8), %s640_s25, 256, %s146_s30, %s134_s24  }
  0x41   : > { %p716_p6 = scmp.ne.s32.totalorder %s715_s16, 0 }
  0x42   : > { %s156_s7 = sand.u32 (!%p716_p6), 1, %s512_s10   ;;  %p717_p12 = scmp.ne.s32.totalorder (!%p716_p6), %s711_s18, 0 }
  0x43   : > { %154 = sbr.rel (%p716_p6) target bundleno = 558 (0x22e), region = 28  ;;  %s356_s8 = sshll.u32 (!%p716_p6), %s156_s7, 4 }
  0x44   : > { %s157_s9 = scalar_lea.sflag (!%p716_p6), [#allocation3], %s156_s7  ;;  %s160_s15 = scalar_lea.vmem (!%p716_p6), [#allocation2], %s356_s8 }
  0x4a   : > { %499 = dma.done.wait (%p717_p12), %s157_s9, 256  }
  0x4b   : > { %501 = vsyncadd (%p717_p12), %s157_s9, 4294967040  ;;  %s166_s22 = scalar_lea.sflag [#allocation5], %s156_s7  ;;  %s169_s23 = scalar_lea.vmem [#allocation4], %s356_s8 }
  0x4c   : > { %503 = dma.done.wait (%p717_p12), %s166_s22, 256  }
  0x4d   : > { %505 = vsyncadd (%p717_p12), %s166_s22, 4294967040  ;;  %s359_s27 = sshll.u32 %s558_s13, 3  ;;  %v203_v0 = vlaneseq  ;;  %v198_v4 = vld [vmem:[%s160_s15] sm:$0xff]  ;;  %v199_v5 = vld [vmem:[%s160_s15 + $0x8] sm:$0xff]  ;;  %p194_p7 = scmp.lt.s32.totalorder %s558_s13, 1  ;;  %vm256_vm1 = vcmask 7168  }
  0x4e   : > { %v205_v1 = vstv %s359_s27  ;;  %v200_v6 = vld [vmem:[%s169_s23] sm:$0xff]  ;;  %v201_v9 = vld [vmem:[%s169_s23 + $0x8] sm:$0xff] }
  0x4f   : > { %v204_v2 = vshrl.u32 %v203_v0, 7  ;;  %s723_s13 = smov (!%p194_p7, %s558_s13), 1 }
  0x50   : > { %s358_s18 = sshll.u32 %s723_s13, 3 }
  0x51   : > { %v676_v3 = vadd.s32 %v205_v1, %v204_v2  ;;  %s197_s29 = scalar_lea.vmem %s709_s2, %s358_s18 }
  0x53   : > { %vm207_vm0 = vcmp.lt.s32.totalorder %v676_v3, 16 }
  0x54   : > { %v210_v7 = vsel %vm207_vm0, %v198_v4, 0.0  ;;  %v211_v8 = vsel %vm207_vm0, %v199_v5, 0.0  ;;  %v212_v10 = vsel %vm207_vm0, %v200_v6, 0.0  ;;  %v213_v12 = vsel %vm207_vm0, %v201_v9, 0.0 }
  0x55   : > { %v214_v11 = vmax.f32 %v210_v7, %v211_v8  ;;  %v230_v13 = vmax.f32 %v212_v10, %v213_v12 }
  0x57   : > { %215 = vmax.xlane.f32.xlu0 %v214_v11 }
  0x5b   : > { %231 = vmax.xlane.f32.xlu0 %v230_v13 }
  0xe4   : > { %v216_v14 = vpop.xlane.xlu0 %215 }
  0xe5   : > { %v217_v15 = vsub.f32 %v210_v7, %v216_v14  ;;  %v218_v16 = vsub.f32 %v211_v8, %v216_v14 }
  0xe7   : > { %v219_v17 = vmul.f32 1.442695, %v217_v15  ;;  %v221_v18 = vmul.f32 1.442695, %v218_v16 }
  0xe8   : > { %v232_v19 = vpop.xlane.xlu0 %231 }
  0xe9   : > { %408 = vpow2.f32 %v219_v17  ;;  %v233_v20 = vsub.f32 %v212_v10, %v232_v19  ;;  %v234_v21 = vsub.f32 %v213_v12, %v232_v19 }
  0xea   : > { %410 = vpow2.f32 %v221_v18 }
  0xeb   : > { %v235_v22 = vmul.f32 1.442695, %v233_v20  ;;  %v237_v23 = vmul.f32 1.442695, %v234_v21 }
  0xed   : > { %412 = vpow2.f32 %v235_v22 }
  0xee   : > { %414 = vpow2.f32 %v237_v23 }
  0xf3   : > { %v409_v24 = vpop.eup %408 }
  0xf4   : > { %v411_v25 = vpop.eup %410 }
  0xf5   : > { %v223_v26 = vadd.f32 %v411_v25, %v409_v24 }
  0xf7   : > { %v413_v27 = vpop.eup %412  ;;  %224 = vadd.xlane.f32.xlu1 %v223_v26 }
  0xf8   : > { %v415_v28 = vpop.eup %414 }
  0xf9   : > { %v239_v29 = vadd.f32 %v415_v28, %v413_v27 }
  0xfb   : > { %240 = vadd.xlane.f32.xlu1 %v239_v29 }
 0x184   : > { %v225_v30 = vpop.xlane.xlu1 %224 }
 0x185   : > { %416 = vlog2.f32 %v225_v30 }
 0x188   : > { %v241_v31 = vpop.xlane.xlu1 %240 }
 0x189   : > { %418 = vlog2.f32 %v241_v31 }
 0x18a   : > { %420 = vrcp.f32 %v241_v31 }
 0x18f   : > { %v417_v32 = vpop.eup %416 }
 0x190   : > { %v227_v33 = vmul.f32 0.6931472, %v417_v32 }
 0x192   : > { %v228_v34 = vsub.f32 %v217_v15, %v227_v33  ;;  %v229_v35 = vsub.f32 %v218_v16, %v227_v33 }
 0x193   : > { %v419_v36 = vpop.eup %418 }
 0x194   : > { %v244_v37 = vsub.f32 %v233_v20, %v228_v34  ;;  %v245_v38 = vsub.f32 %v234_v21, %v229_v35  ;;  %v243_v39 = vmul.f32 0.6931472, %v419_v36  ;;  %v421_v45 = vpop.eup %420 }
 0x196   : > { %v246_v40 = vsub.f32 %v244_v37, %v243_v39  ;;  %v247_v41 = vsub.f32 %v245_v38, %v243_v39 }
 0x198   : > { %v248_v42 = vmul.f32 %v413_v27, %v246_v40  ;;  %v249_v43 = vmul.f32 %v415_v28, %v247_v41 }
 0x19a   : > { %v250_v44 = vadd.f32 %v249_v43, %v248_v42 }
 0x19c   : > { %251 = vadd.xlane.f32.xlu0 %v250_v44 }
 0x229   : > { %v252_v46 = vpop.xlane.xlu0 %251 }
 0x22a   : > { %v254_v47 = vmul.f32 %v421_v45, %v252_v46 }
 0x22c   : > { %v255_v48 = vsel %vm207_vm0, %v254_v47, 0.0 }
 0x22d   : > { %257 = vst.msk [vmem:[%s197_s29] sm:$0xff] %vm256_vm1, %v255_v48 }
 0x22e PF: > { %p15_p8 = scmp.ge.s32.totalorder %s561_s14, 4   ;;  %s718_s9 = smov %s512_s10 }
 0x22f   : > { %s719_s10 = smov %s516_s11  ;;  %s720_s11 = smov %s571_s17 }
 0x230   : > { %s721_s12 = smov %s561_s14  ;;  %17 = sbr.rel (!%p15_p8) target bundleno = 5 (0x5), region = 81 }
 0x237   :  { %277 = vsyncpa [#allocation3], 1 }
 0x238   :  { %279 = vsyncpa [#allocation3 + $0x1], 1 }
 0x239   :  { %280 = vsyncpa [#allocation5], 1 }
 0x23a   :  { %282 = vsyncpa [#allocation5 + $0x1], 1 }

</bundles_post_ra>
